<compile_context>
chip_gen: v6e
topology: v6e:2x2x1
jax: 0.10.0
libtpu: 0.0.40
codegen_flags: <defaults>
</compile_context>

<pallas_src>
import functools

import jax
import jax.numpy as jnp
from jax.experimental import pallas as pl
from jax.experimental.pallas import tpu as pltpu


def _round_up(x, m):
    return ((x + m - 1) // m) * m


def _choose_tiling(batch, block_batch):
    """Pick (batch_tile, padded_batch, n_tiles).

    - batch tile is a multiple of 8 (f32 sublane alignment), capped at block_batch
    - at least 2 tiles when batch >= 16 so v7x's 2nd TensorCore gets work
    - pad waste is bounded by ~8 rows per tile (no pad-to-TB blowup)
    """
    block_batch = max(8, _round_up(block_batch, 8))
    b8 = _round_up(max(batch, 1), 8)
    n_tiles = -(-b8 // block_batch)
    if n_tiles == 1 and b8 >= 16:
        n_tiles = 2
    tb = _round_up(-(-b8 // n_tiles), 8)
    b_pad = n_tiles * tb
    return tb, b_pad, n_tiles


def actor_kernel(x_ref, w1_ref, b1_ref, w2_ref, b2_ref, w3_ref, b3_ref, o_ref):
    wdt = w1_ref.dtype  # bf16 (fast path) or f32 (exact-PyTorch path)
    # fc1 + relu  (MXU matmul, f32 accumulation; epilogue in f32 on VPU)
    x = x_ref[...].astype(wdt)
    h1 = jnp.dot(x, w1_ref[...], preferred_element_type=jnp.float32)
    h1 = jnp.maximum(h1 + b1_ref[...], 0.0)
    # fc2 + relu
    h2 = jnp.dot(h1.astype(wdt), w2_ref[...], preferred_element_type=jnp.float32)
    h2 = jnp.maximum(h2 + b2_ref[...], 0.0)
    # fc3 + tanh  (narrow N == action_dim; output stored un-padded)
    h3 = jnp.dot(h2.astype(wdt), w3_ref[...], preferred_element_type=jnp.float32)
    o_ref[...] = jnp.tanh(h3 + b3_ref[...]).astype(o_ref.dtype)


@functools.partial(jax.jit, static_argnames=("block_batch",))
def actor_forward(state, params, *, block_batch=512):
    """state: [B, state_dim] float32.

    params: dict of w1,b1,w2,b2,w3,b3 with weights stored [in, out]
    (transposed from PyTorch).  Use prepare_actor_params() to pre-cast the
    weights to bf16 once; pass f32 weights for exact f32 semantics.
    """
    w1, b1, w2, b2, w3, b3 = (params[k] for k in ("w1", "b1", "w2", "b2", "w3", "b3"))
    B, state_dim = state.shape
    hidden = w1.shape[1]
    action_dim = w3.shape[1]

    # --- batch tiling (>=2 tiles for v7x megacore, minimal padding) ---------
    TB, B_pad, n_tiles = _choose_tiling(B, block_batch)
    if B_pad != B:
        state = jnp.zeros((B_pad, state_dim), state.dtype).at[:B].set(state)
    grid = (n_tiles,)

    # --- weights/biases: constant index_map -> DMA'd once, VMEM-resident ----
    # Single-buffer them when the footprint is big enough that double
    # buffering would waste meaningful VMEM (v7x: 64 MiB physical / 32 scoped).
    weight_bytes = sum(a.size * a.dtype.itemsize for a in (w1, w2, w3, b1, b2, b3))
    single_buffer = weight_bytes >= (4 << 20)

    def const(a):
        kwargs = {"pipeline_mode": pl.Buffered(1)} if single_buffer else {}
        return pl.BlockSpec(a.shape, lambda i: (0,) * a.ndim, **kwargs)

    flops = 2 * B_pad * (state_dim * hidden + hidden * hidden + hidden * action_dim)
    bytes_accessed = (
        state.size * state.dtype.itemsize
        + weight_bytes
        + B_pad * action_dim * 4
    )

    out = pl.pallas_call(
        actor_kernel,
        out_shape=jax.ShapeDtypeStruct((B_pad, action_dim), jnp.float32),
        grid=grid,
        in_specs=[
            pl.BlockSpec((TB, state_dim), lambda i: (i, 0)),
            const(w1), const(b1), const(w2), const(b2), const(w3), const(b3),
        ],
        # Un-padded output: last dim equals the full array dim (legal), so the
        # HBM writeback is action_dim*4 bytes/row instead of 512 bytes/row.
        out_specs=pl.BlockSpec((TB, action_dim), lambda i: (i, 0)),
        compiler_params=pltpu.CompilerParams(
            dimension_semantics=("parallel",),
            vmem_limit_bytes=32 << 20,
        ),
        cost_estimate=pl.CostEstimate(
            flops=int(flops),
            transcendentals=int(B_pad * action_dim),
            bytes_accessed=int(bytes_accessed),
        ),
    )(state, w1, b1, w2, b2, w3, b3)

    return out[:B]


def prepare_actor_params(params, compute_dtype=jnp.bfloat16):
    """Pre-materialize kernel-ready params ONCE (outside the per-step call):
    matmul weights in `compute_dtype` (bf16 fast path / f32 exact path),
    biases kept f32 for the VPU/EUP epilogue."""
    out = {}
    for k in ("w1", "w2", "w3"):
        out[k] = jnp.asarray(params[k], compute_dtype)
    for k in ("b1", "b2", "b3"):
        out[k] = jnp.asarray(params[k], jnp.float32)
    return out


def init_actor_params(key, state_dim, action_dim, hidden_dim=256):
    """Deterministic init mimicking PyTorch nn.Linear default:
    U(-1/sqrt(fan_in), 1/sqrt(fan_in)) for both weight and bias."""
    keys = jax.random.split(key, 6)

    def linear(kw, kb, fan_in, fan_out):
        bound = 1.0 / jnp.sqrt(jnp.float32(fan_in))
        w = jax.random.uniform(kw, (fan_in, fan_out), jnp.float32, -bound, bound)
        b = jax.random.uniform(kb, (1, fan_out), jnp.float32, -bound, bound)
        return w, b

    w1, b1 = linear(keys[0], keys[1], state_dim, hidden_dim)
    w2, b2 = linear(keys[2], keys[3], hidden_dim, hidden_dim)
    w3, b3 = linear(keys[4], keys[5], hidden_dim, action_dim)
    return {"w1": w1, "b1": b1, "w2": w2, "b2": b2, "w3": w3, "b3": b3}


def actor_reference(state, params):
    """Pure-JAX reference mirroring the kernel math for whatever weight dtype
    `params` carries (bf16-operand/f32-accum, or exact f32)."""
    wdt = params["w1"].dtype
    h1 = jnp.dot(state.astype(wdt), params["w1"], preferred_element_type=jnp.float32)
    h1 = jnp.maximum(h1 + params["b1"], 0.0)
    h2 = jnp.dot(h1.astype(wdt), params["w2"], preferred_element_type=jnp.float32)
    h2 = jnp.maximum(h2 + params["b2"], 0.0)
    h3 = jnp.dot(h2.astype(wdt), params["w3"], preferred_element_type=jnp.float32)
    return jnp.tanh(h3 + params["b3"])


if __name__ == "__main__":
    key = jax.random.PRNGKey(0)
    k_param, k_state = jax.random.split(key)

    batch = 2
    state_dim = 8
    action_dim = 4
    hidden_dim = 32  # small hidden for the example run

    params_f32 = init_actor_params(k_param, state_dim, action_dim, hidden_dim)
    params = prepare_actor_params(params_f32)  # bf16 weights, built once
    state = jax.random.normal(k_state, (batch, state_dim), jnp.float32)

    out = actor_forward(state, params)
    out = jax.block_until_ready(out)
    assert out.shape == (batch, action_dim)
    assert out.dtype == jnp.float32

    # Tight check vs a reference mirroring the bf16-operand matmul path.
    ref_bf16 = actor_reference(state, params)
    assert jnp.allclose(out, ref_bf16, atol=1e-4, rtol=1e-4), "mismatch vs bf16 reference"

    # Loose sanity check vs pure-f32 PyTorch-module semantics.
    ref_f32 = actor_reference(state, params_f32)
    assert jnp.allclose(out, ref_f32, atol=3e-2, rtol=3e-2), "mismatch vs f32 reference"

    print("KERNEL_OK")
</pallas_src>

<mosaic_0001>
module attributes {stable_mosaic.version = 11 : i64} {
  func.func @actor_kernel(%arg0: i32, %arg1: memref<8x8xf32, #tpu.memory_space<vmem>>, %arg2: memref<8x32xbf16, #tpu.memory_space<vmem>>, %arg3: memref<1x32xf32, #tpu.memory_space<vmem>>, %arg4: memref<32x32xbf16, #tpu.memory_space<vmem>>, %arg5: memref<1x32xf32, #tpu.memory_space<vmem>>, %arg6: memref<32x4xbf16, #tpu.memory_space<vmem>>, %arg7: memref<1x4xf32, #tpu.memory_space<vmem>>, %arg8: memref<8x4xf32, #tpu.memory_space<vmem>>) attributes {dimension_semantics = [#tpu.dimension_semantics<parallel>], iteration_bounds = array<i64: 1>, scalar_prefetch = 0 : i64, scratch_operands = 0 : i64, tpu.core_type = #tpu.core_type<tc>, window_params = [{transform_indices = @transform_0, window_bounds = array<i64: 8, 8>}, {pipeline_mode = #tpu.pipeline_mode<synchronous>, transform_indices = @transform_1, window_bounds = array<i64: 8, 32>}, {pipeline_mode = #tpu.pipeline_mode<synchronous>, transform_indices = @transform_2, window_bounds = array<i64: 1, 32>}, {pipeline_mode = #tpu.pipeline_mode<synchronous>, transform_indices = @transform_3, window_bounds = array<i64: 32, 32>}, {pipeline_mode = #tpu.pipeline_mode<synchronous>, transform_indices = @transform_4, window_bounds = array<i64: 1, 32>}, {pipeline_mode = #tpu.pipeline_mode<synchronous>, transform_indices = @transform_5, window_bounds = array<i64: 32, 4>}, {pipeline_mode = #tpu.pipeline_mode<synchronous>, transform_indices = @transform_6, window_bounds = array<i64: 1, 4>}, {transform_indices = @transform_7, window_bounds = array<i64: 8, 4>}]} {
    %c0 = arith.constant 0 : index
    %c0_0 = arith.constant 0 : index
    %0 = vector.load %arg1[%c0, %c0_0] : memref<8x8xf32, #tpu.memory_space<vmem>>, vector<8x8xf32>
    %1 = arith.truncf %0 : vector<8x8xf32> to vector<8x8xbf16>
    %c0_1 = arith.constant 0 : index
    %c0_2 = arith.constant 0 : index
    %2 = vector.load %arg2[%c0_1, %c0_2] : memref<8x32xbf16, #tpu.memory_space<vmem>>, vector<8x32xbf16>
    %cst = arith.constant dense<0.000000e+00> : vector<8x32xf32>
    %3 = tpu.matmul %1, %2, %cst {dimension_numbers = #tpu.dot_dimension_numbers<[1], [0], [0], [1], [0, 0, 1, 1], [], []>} : vector<8x8xbf16>, vector<8x32xbf16>, vector<8x32xf32> -> vector<8x32xf32>
    %c0_3 = arith.constant 0 : index
    %c0_4 = arith.constant 0 : index
    %4 = vector.load %arg3[%c0_3, %c0_4] : memref<1x32xf32, #tpu.memory_space<vmem>>, vector<1x32xf32>
    %5 = vector.broadcast %4 : vector<1x32xf32> to vector<8x32xf32>
    %6 = arith.addf %3, %5 : vector<8x32xf32>
    %cst_5 = arith.constant 0.000000e+00 : f32
    %7 = vector.broadcast %cst_5 : f32 to vector<8x32xf32>
    %8 = arith.maximumf %6, %7 : vector<8x32xf32>
    %9 = arith.truncf %8 : vector<8x32xf32> to vector<8x32xbf16>
    %c0_6 = arith.constant 0 : index
    %c0_7 = arith.constant 0 : index
    %10 = vector.load %arg4[%c0_6, %c0_7] : memref<32x32xbf16, #tpu.memory_space<vmem>>, vector<32x32xbf16>
    %cst_8 = arith.constant dense<0.000000e+00> : vector<8x32xf32>
    %11 = tpu.matmul %9, %10, %cst_8 {dimension_numbers = #tpu.dot_dimension_numbers<[1], [0], [0], [1], [0, 0, 1, 1], [], []>} : vector<8x32xbf16>, vector<32x32xbf16>, vector<8x32xf32> -> vector<8x32xf32>
    %c0_9 = arith.constant 0 : index
    %c0_10 = arith.constant 0 : index
    %12 = vector.load %arg5[%c0_9, %c0_10] : memref<1x32xf32, #tpu.memory_space<vmem>>, vector<1x32xf32>
    %13 = vector.broadcast %12 : vector<1x32xf32> to vector<8x32xf32>
    %14 = arith.addf %11, %13 : vector<8x32xf32>
    %cst_11 = arith.constant 0.000000e+00 : f32
    %15 = vector.broadcast %cst_11 : f32 to vector<8x32xf32>
    %16 = arith.maximumf %14, %15 : vector<8x32xf32>
    %17 = arith.truncf %16 : vector<8x32xf32> to vector<8x32xbf16>
    %c0_12 = arith.constant 0 : index
    %c0_13 = arith.constant 0 : index
    %18 = vector.load %arg6[%c0_12, %c0_13] : memref<32x4xbf16, #tpu.memory_space<vmem>>, vector<32x4xbf16>
    %cst_14 = arith.constant dense<0.000000e+00> : vector<8x4xf32>
    %19 = tpu.matmul %17, %18, %cst_14 {dimension_numbers = #tpu.dot_dimension_numbers<[1], [0], [0], [1], [0, 0, 1, 1], [], []>} : vector<8x32xbf16>, vector<32x4xbf16>, vector<8x4xf32> -> vector<8x4xf32>
    %c0_15 = arith.constant 0 : index
    %c0_16 = arith.constant 0 : index
    %20 = vector.load %arg7[%c0_15, %c0_16] : memref<1x4xf32, #tpu.memory_space<vmem>>, vector<1x4xf32>
    %21 = vector.broadcast %20 : vector<1x4xf32> to vector<8x4xf32>
    %22 = arith.addf %19, %21 : vector<8x4xf32>
    %23 = math.tanh %22 : vector<8x4xf32>
    %c0_17 = arith.constant 0 : index
    %c0_18 = arith.constant 0 : index
    %24 = vector.load %arg8[%c0_17, %c0_18] : memref<8x4xf32, #tpu.memory_space<vmem>>, vector<8x4xf32>
    tpu.vector_store %arg8[%c0_17, %c0_18], %23 {strides = array<i32>} : memref<8x4xf32, #tpu.memory_space<vmem>>, vector<8x4xf32>,
    return
  }
  func.func @transform_0(%arg0: i32) -> (i32, i32) {
    %c0_i32 = arith.constant 0 : i32
    %c0_i32_0 = arith.constant 0 : i32
    return %arg0, %c0_i32 : i32, i32
  }
  func.func @transform_1(%arg0: i32) -> (i32, i32) {
    %c0_i32 = arith.constant 0 : i32
    %c0_i32_0 = arith.constant 0 : i32
    %c0_i32_1 = arith.constant 0 : i32
    return %c0_i32, %c0_i32_0 : i32, i32
  }
  func.func @transform_2(%arg0: i32) -> (i32, i32) {
    %c0_i32 = arith.constant 0 : i32
    %c0_i32_0 = arith.constant 0 : i32
    %c0_i32_1 = arith.constant 0 : i32
    return %c0_i32, %c0_i32_0 : i32, i32
  }
  func.func @transform_3(%arg0: i32) -> (i32, i32) {
    %c0_i32 = arith.constant 0 : i32
    %c0_i32_0 = arith.constant 0 : i32
    %c0_i32_1 = arith.constant 0 : i32
    return %c0_i32, %c0_i32_0 : i32, i32
  }
  func.func @transform_4(%arg0: i32) -> (i32, i32) {
    %c0_i32 = arith.constant 0 : i32
    %c0_i32_0 = arith.constant 0 : i32
    %c0_i32_1 = arith.constant 0 : i32
    return %c0_i32, %c0_i32_0 : i32, i32
  }
  func.func @transform_5(%arg0: i32) -> (i32, i32) {
    %c0_i32 = arith.constant 0 : i32
    %c0_i32_0 = arith.constant 0 : i32
    %c0_i32_1 = arith.constant 0 : i32
    return %c0_i32, %c0_i32_0 : i32, i32
  }
  func.func @transform_6(%arg0: i32) -> (i32, i32) {
    %c0_i32 = arith.constant 0 : i32
    %c0_i32_0 = arith.constant 0 : i32
    %c0_i32_1 = arith.constant 0 : i32
    return %c0_i32, %c0_i32_0 : i32, i32
  }
  func.func @transform_7(%arg0: i32) -> (i32, i32) {
    %c0_i32 = arith.constant 0 : i32
    %c0_i32_0 = arith.constant 0 : i32
    return %arg0, %c0_i32 : i32, i32
  }
}

</mosaic_0001>

<bundles_post_ra>
// kernel: actor_forward.1
= control target key start
LH: loop header
LB: loop body
LE: loop exit
PB: predicated region body
PF: predicated region fallthrough
CT: control target
= control target key end

     0   :  { %vm41_vm0 = vcmask 1043456   ;;  %v277_v0 = vmov 0.0   ;;  %vm278_vm1 = vmmov 0   ;;  %vm37_vm2 = vcmask 64512   ;;  %s349_s1 = inlined_call_operand.vmem [shape: bf16[8,32], index: 1, kind: input, shape index: {}]   ;;  %s350_s0 = inlined_call_operand.vmem [shape: f32[8,8], index: 0, kind: input, shape index: {}]   ;;  %s351_s3 = inlined_call_operand.vmem [shape: bf16[32,32], index: 3, kind: input, shape index: {}]   ;;  %s352_s5 = inlined_call_operand.vmem [shape: bf16[32,4], index: 5, kind: input, shape index: {}]   ;;  %s353_s2 = inlined_call_operand.vmem [shape: f32[1,32], index: 2, kind: input, shape index: {}]   ;;  %s354_s4 = inlined_call_operand.vmem [shape: f32[1,32], index: 4, kind: input, shape index: {}]   ;;  %s355_s6 = inlined_call_operand.vmem [shape: f32[1,4], index: 6, kind: input, shape index: {}]   ;;  %s356_s7 = inlined_call_operand.vmem [shape: f32[8,4], index: 7, kind: output, shape index: {}]  }
   0x1   :  { %247 = vmatprep.subr.bf16.mxu0 %v277_v0  ;;  %v29_v1 = vld [vmem:[%s349_s1] sm:$0xf]  ;;  %249 = vmatprep.mubr.msk.bf16.mxu0 %vm278_vm1, %v277_v0  ;;  %v271_v5 = vld [vmem:[%s351_s3 + $0x8] sm:$0xff]   ;;  %vm110_vm3 = vcmask 261120   ;;  %vm223_vm4 = vcmask 31744  }
   0x2   :  { %v27_v2 = vld [vmem:[%s350_s0] sm:$0xff]  ;;  %v43_v3 = vsel %vm41_vm0, %v29_v1, 0  ;;  %253 = vmatprep.subr.bf16.mxu1 %v277_v0  ;;  %257 = vmatprep.mubr.msk.bf16.mxu1 %vm278_vm1, %v277_v0  ;;  %v273_v7 = vld [vmem:[%s352_s5 + $0x8] sm:$0xff]  }
   0x3   :  { %v28_v4 = vpack.c.bf16 %v27_v2, %v27_v2  ;;  %248 = vmatpush3.bf16.msra.mxu0 %v43_v3  ;;  %254 = vmatpush3.bf16.msra.mxu1 %v271_v5  ;;  %v272_v6 = vld [vmem:[%s351_s3] sm:$0xff]  }
   0x4   :  { %261 = vmatprep.subr.bf16.mxu0 %v277_v0  ;;  %255 = vmatprep.subr.bf16.mxu1 %v277_v0  ;;  %v229_v8 = vld [vmem:[%s353_s2] ss:$0 sm:$0xff] }
   0x5   :  { %v274_v16 = vld [vmem:[%s352_s5] sm:$0xff]  }
   0x6   :  { %250 = vmatmul.mubr.msk.bf16.vlgmr.msra.gmra.mxu0 %vm37_vm2, %v28_v4  ;;  %v231_v17 = vld [vmem:[%s354_s4] ss:$0 sm:$0xff] }
   0x7   :  { %265 = vmatprep.mubr.msk.bf16.mxu0 %vm278_vm1, %v277_v0  ;;  %256 = vmatpush3.bf16.msra.mxu1 %v272_v6  ;;  %v235_v25 = vld [vmem:[%s355_s6] ss:$0 sm:$0xff] }
   0x8   :  { %262 = vmatpush3.bf16.msra.mxu0 %v273_v7 }
   0x9   :  { %263 = vmatprep.subr.bf16.mxu0 %v277_v0 }
   0xc   :  { %264 = vmatpush3.bf16.msra.mxu0 %v274_v16 }
  0xc6   :  { %v79_v9 = vpop.f32.mrf.mxu0 }
  0xc7   :  { %v80_v10 = vadd.f32 %v229_v8, %v79_v9 }
  0xc8   :  { %v251_v11 = vpop.f32.mrf.mxu0 }
  0xc9   :  { %v85_v12 = vmax.f32 %v80_v10, 0.0 }
  0xca   :  { %v82_v13 = vpop.f32.mrf.mxu0 }
  0xcb   :  { %v86_v14 = vpack.c.bf16 %v85_v12, %v85_v12 }
  0xcc   :  { %v252_v15 = vpop.f32.mrf.mxu0 }
  0xcd   :  { %258 = vmatmul.mubr.msk.bf16.vlgmr.msra.gmra.mxu1 %vm110_vm3, %v86_v14 }
 0x18d   :  { %v148_v18 = vpop.f32.mrf.mxu1 }
 0x18e   :  { %v149_v19 = vadd.f32 %v231_v17, %v148_v18 }
 0x18f   :  { %v259_v20 = vpop.f32.mrf.mxu1 }
 0x190   :  { %v154_v21 = vmax.f32 %v149_v19, 0.0 }
 0x191   :  { %v151_v22 = vpop.f32.mrf.mxu1 }
 0x192   :  { %v155_v23 = vpack.c.bf16 %v154_v21, %v154_v21 }
 0x193   :  { %v260_v24 = vpop.f32.mrf.mxu1 }
 0x194   :  { %266 = vmatmul.mubr.msk.bf16.vlgmr.msra.gmra.mxu0 %vm110_vm3, %v155_v23 }
 0x254   :  { %v216_v26 = vpop.f32.mrf.mxu0 }
 0x255   :  { %v217_v27 = vadd.f32 %v235_v25, %v216_v26 }
 0x256   :  { %v267_v28 = vpop.f32.mrf.mxu0 }
 0x257   :  { %275 = vtanh.f32 %v217_v27 }
 0x258   :  { %v219_v29 = vpop.f32.mrf.mxu0 }
 0x25a   :  { %v268_v30 = vpop.f32.mrf.mxu0 }
 0x264   :  { %v276_v31 = vpop.eup %275 }
 0x265   :  { %224 = vst.msk [vmem:[%s356_s7] sm:$0xff] %vm223_vm4, %v276_v31 }

</bundles_post_ra>
